<compile_context>
chip_gen: v5e
topology: v5e:2x2
jax: 0.10.0
libtpu: 0.0.40
codegen_flags: <defaults>
</compile_context>

<pallas_src>
import functools

import jax
import jax.numpy as jnp
from jax.experimental import pallas as pl
from jax.experimental.pallas import tpu as pltpu

_EPS = 1e-8
_TARGET_BLOCK_BYTES = 1 * 1024 * 1024   # ~1 MiB input block per grid step
_VMEM_LIMIT_BYTES = 32 * 1024 * 1024


def _pick_block_t(bc, h, w, itemsize):
    """How many (H, W) slabs to process per grid step (~1 MiB input block)."""
    t = _TARGET_BLOCK_BYTES // max(1, h * w * itemsize)
    return int(max(1, min(bc, t)))


def _tv_terms(x):
    """x: (T, H, W) f32 -> sqrt(dx^2 + dy^2 + eps), shape (T, H-1, W-1)."""
    dx = x[:, :-1, :-1] - x[:, 1:, :-1]
    dy = x[:, :-1, :-1] - x[:, :-1, 1:]
    return jnp.sqrt(dx * dx + dy * dy + jnp.float32(_EPS))


def _tv_sum_kernel(x_ref, part_ref, *, block_t, bc_total):
    # Reduce-only kernel (average=True): one f32 partial sum per grid step,
    # splatted into a lane-dense (1, 8, 128) output block. No gradient map
    # ever touches HBM on this path.
    pid = pl.program_id(0)
    x = x_ref[...].astype(jnp.float32)          # cast fused into the kernel
    g = _tv_terms(x)                            # (T, H-1, W-1)
    # Mask slabs beyond B*C (possible on the last, partial grid step).
    slab = jax.lax.broadcasted_iota(jnp.int32, g.shape, 0) + pid * block_t
    g = jnp.where(slab < bc_total, g, jnp.float32(0.0))
    s = jnp.sum(g)
    part_ref[...] = jnp.broadcast_to(s, part_ref.shape)


def _tv_map_kernel(x_ref, grad_ref):
    # Map kernel (average=False): writes the TV map for T slabs at once.
    x = x_ref[...].astype(jnp.float32)
    grad_ref[...] = _tv_terms(x).astype(grad_ref.dtype)


def tv_sparsity(x, average=True, do_sqrt=True, *, block_t=None):
    """JAX/Pallas equivalent of TV_sparsity(do_sqrt=True).forward(x, average)."""
    assert do_sqrt, "only the do_sqrt=True branch is implemented in the kernel"
    # TODO(synk): do_sqrt=False branch (abs-sum reduction over spatial dims) not implemented.
    b, c, h, w = x.shape
    bc = b * c
    xf = x.reshape(bc, h, w)  # contiguous NCHW collapse: metadata-only, no copy
    if block_t is None:
        block_t = _pick_block_t(bc, h, w, xf.dtype.itemsize)
    block_t = int(max(1, min(bc, block_t)))
    num_steps = pl.cdiv(bc, block_t)

    cparams = pltpu.CompilerParams(
        dimension_semantics=("parallel",),
        vmem_limit_bytes=_VMEM_LIMIT_BYTES,
    )
    in_specs = [pl.BlockSpec((block_t, h, w), lambda i: (i, 0, 0))]

    if average:
        partials = pl.pallas_call(
            functools.partial(_tv_sum_kernel, block_t=block_t, bc_total=bc),
            out_shape=jax.ShapeDtypeStruct((num_steps, 8, 128), jnp.float32),
            grid_spec=pltpu.PrefetchScalarGridSpec(
                num_scalar_prefetch=0,
                grid=(num_steps,),
                in_specs=in_specs,
                out_specs=pl.BlockSpec((1, 8, 128), lambda i: (i, 0, 0)),
            ),
            compiler_params=cparams,
        )(xf)
        count = jnp.float32(bc * (h - 1) * (w - 1))
        return jnp.sum(partials[:, 0, 0]) / count

    grad_flat = pl.pallas_call(
        _tv_map_kernel,
        out_shape=jax.ShapeDtypeStruct((bc, h - 1, w - 1), x.dtype),
        grid_spec=pltpu.PrefetchScalarGridSpec(
            num_scalar_prefetch=0,
            grid=(num_steps,),
            in_specs=in_specs,
            out_specs=pl.BlockSpec((block_t, h - 1, w - 1), lambda i: (i, 0, 0)),
        ),
        compiler_params=cparams,
    )(xf)
    return grad_flat.reshape(b, c, h - 1, w - 1)


def _tv_sparsity_ref(x, average=True):
    # pure-JAX reference mirroring the PyTorch module (do_sqrt=True)
    x = x.astype(jnp.float32)
    dx = x[:, :, :-1, :-1] - x[:, :, 1:, :-1]
    dy = x[:, :, :-1, :-1] - x[:, :, :-1, 1:]
    g = jnp.sqrt(dx * dx + dy * dy + 1e-8)
    return g.mean() if average else g


if __name__ == "__main__":
    key = jax.random.PRNGKey(0)
    x = jax.random.normal(key, (2, 4, 16, 16), dtype=jnp.float32)

    # mean path (reduce-only kernel, no gradient map written to HBM)
    out = jax.block_until_ready(tv_sparsity(x, average=True))
    ref = _tv_sparsity_ref(x, average=True)
    assert jnp.allclose(out, ref, rtol=1e-5, atol=1e-5), (out, ref)

    # map path
    out_map = jax.block_until_ready(tv_sparsity(x, average=False))
    ref_map = _tv_sparsity_ref(x, average=False)
    assert out_map.shape == (2, 4, 15, 15)
    assert jnp.allclose(out_map, ref_map, rtol=1e-5, atol=1e-5)

    # exercise multi-step grid with a partial last block (B*C=8, T=3 -> 3 steps)
    out_p = jax.block_until_ready(tv_sparsity(x, average=True, block_t=3))
    assert jnp.allclose(out_p, ref, rtol=1e-5, atol=1e-5), (out_p, ref)
    out_map_p = jax.block_until_ready(tv_sparsity(x, average=False, block_t=3))
    assert jnp.allclose(out_map_p, ref_map, rtol=1e-5, atol=1e-5)

    # exercise the fused in-kernel cast with a bf16 input
    xb = jax.random.normal(jax.random.PRNGKey(1), (2, 4, 16, 16), dtype=jnp.bfloat16)
    out_b = jax.block_until_ready(tv_sparsity(xb, average=True))
    ref_b = _tv_sparsity_ref(xb, average=True)
    assert jnp.allclose(out_b, ref_b, rtol=1e-4, atol=1e-5), (out_b, ref_b)

    print("KERNEL_OK")
</pallas_src>

<mosaic_0001>
module attributes {stable_mosaic.version = 11 : i64} {
  func.func @_tv_sum_kernel(%arg0: i32, %arg1: memref<8x16x16xf32, #tpu.memory_space<vmem>>, %arg2: memref<1x8x128xf32, #tpu.memory_space<vmem>>) attributes {dimension_semantics = [#tpu.dimension_semantics<parallel>], iteration_bounds = array<i64: 1>, scalar_prefetch = 0 : i64, scratch_operands = 0 : i64, tpu.core_type = #tpu.core_type<tc>, window_params = [{transform_indices = @transform_0, window_bounds = array<i64: 8, 16, 16>}, {transform_indices = @transform_1, window_bounds = array<i64: 1, 8, 128>}]} {
    %c0 = arith.constant 0 : index
    %c0_0 = arith.constant 0 : index
    %c0_1 = arith.constant 0 : index
    %0 = vector.load %arg1[%c0, %c0_0, %c0_1] : memref<8x16x16xf32, #tpu.memory_space<vmem>>, vector<8x16x16xf32>
    %1 = vector.extract_strided_slice %0 {offsets = [0, 0, 0], sizes = [8, 15, 15], strides = [1, 1, 1]} : vector<8x16x16xf32> to vector<8x15x15xf32>
    %2 = vector.extract_strided_slice %0 {offsets = [0, 1, 0], sizes = [8, 15, 15], strides = [1, 1, 1]} : vector<8x16x16xf32> to vector<8x15x15xf32>
    %3 = arith.subf %1, %2 : vector<8x15x15xf32>
    %4 = vector.extract_strided_slice %0 {offsets = [0, 0, 0], sizes = [8, 15, 15], strides = [1, 1, 1]} : vector<8x16x16xf32> to vector<8x15x15xf32>
    %5 = vector.extract_strided_slice %0 {offsets = [0, 0, 1], sizes = [8, 15, 15], strides = [1, 1, 1]} : vector<8x16x16xf32> to vector<8x15x15xf32>
    %6 = arith.subf %4, %5 : vector<8x15x15xf32>
    %7 = arith.mulf %3, %3 : vector<8x15x15xf32>
    %8 = arith.mulf %6, %6 : vector<8x15x15xf32>
    %9 = arith.addf %7, %8 : vector<8x15x15xf32>
    %cst = arith.constant 9.99999993E-9 : f32
    %10 = vector.broadcast %cst : f32 to vector<8x15x15xf32>
    %11 = arith.addf %9, %10 : vector<8x15x15xf32>
    %12 = math.sqrt %11 : vector<8x15x15xf32>
    %13 = tpu.iota {dimensions = array<i32: 0>} : vector<8x15x15xi32>
    %c8_i32 = arith.constant 8 : i32
    %14 = arith.muli %arg0, %c8_i32 : i32
    %15 = vector.broadcast %14 : i32 to vector<8x15x15xi32>
    %16 = arith.addi %13, %15 : vector<8x15x15xi32>
    %c8_i32_2 = arith.constant 8 : i32
    %17 = vector.broadcast %c8_i32_2 : i32 to vector<8x15x15xi32>
    %18 = arith.cmpi slt, %16, %17 : vector<8x15x15xi32>
    %cst_3 = arith.constant 0.000000e+00 : f32
    %19 = vector.broadcast %cst_3 : f32 to vector<8x15x15xf32>
    %20 = arith.select %18, %12, %19 : vector<8x15x15xi1>, vector<8x15x15xf32>
    %21 = vector.shape_cast %20 : vector<8x15x15xf32> to vector<1x8x15x15xf32>
    %cst_4 = arith.constant dense<0.000000e+00> : vector<1xf32>
    %22 = vector.multi_reduction <add>, %21, %cst_4 [1, 2, 3] : vector<1x8x15x15xf32> to vector<1xf32>
    %23 = vector.shape_cast %22 : vector<1xf32> to vector<1x1x1x1xf32>
    %24 = vector.extract %23[0, 0, 0, 0] : f32 from vector<1x1x1x1xf32>
    %25 = vector.broadcast %24 : f32 to vector<1x8x128xf32>
    %c0_5 = arith.constant 0 : index
    %c0_6 = arith.constant 0 : index
    %c0_7 = arith.constant 0 : index
    %26 = vector.load %arg2[%c0_5, %c0_6, %c0_7] : memref<1x8x128xf32, #tpu.memory_space<vmem>>, vector<1x8x128xf32>
    tpu.vector_store %arg2[%c0_5, %c0_6, %c0_7], %25 {strides = array<i32>} : memref<1x8x128xf32, #tpu.memory_space<vmem>>, vector<1x8x128xf32>,
    return
  }
  func.func @transform_0(%arg0: i32) -> (i32, i32, i32) {
    %c0_i32 = arith.constant 0 : i32
    %c0_i32_0 = arith.constant 0 : i32
    %c0_i32_1 = arith.constant 0 : i32
    return %arg0, %c0_i32, %c0_i32_0 : i32, i32, i32
  }
  func.func @transform_1(%arg0: i32) -> (i32, i32, i32) {
    %c0_i32 = arith.constant 0 : i32
    %c0_i32_0 = arith.constant 0 : i32
    %c0_i32_1 = arith.constant 0 : i32
    return %arg0, %c0_i32, %c0_i32_0 : i32, i32, i32
  }
}

</mosaic_0001>

<bundles_post_ra>
// kernel: tpu_custom_call.1
= control target key start
LH: loop header
LB: loop body
LE: loop exit
PB: predicated region body
PF: predicated region fallthrough
CT: control target
= control target key end

     0   :  { %6 = vsyncpa [#allocation3], 0  ;;  %s1030_s0 = inlined_call_operand.hbm [shape: f32[8,16,16], index: 0, kind: input, shape index: {}]   ;;  %s1031_s1 = inlined_call_operand.hbm [shape: f32[1,8,128], index: 1, kind: output, shape index: {}]  }
   0x1   :  { %7 = vsyncpa [#allocation4], 0  ;;  %s12_s8 = sshll.u32 %s1030_s0, 4  ;;  %s619_s9 = smov [#allocation2]   ;;  %s13_s8 = int_to_ptr.hbm [resolvable:$true] %s12_s8 }
   0x2   :  { %s14_s10 = sshll.u32 %s619_s9, 4  ;;  %s620_s11 = smov 128   ;;  %s15_s10 = int_to_ptr.vmem [resolvable:$true] %s14_s10 }
   0x3   :  { %s621_s12 = smov 8  }
   0x4   :  { %20 = dma.hbm_to_vmem [thread:$0]  %s13_s8, 2048, %s15_s10, [#allocation3], %s620_s11, %s620_s11, %s621_s12  }
   0x5   :  { %615 = dma.done.wait [#allocation3], 2048  }
   0x6   :  { %616 = vsyncadd [#allocation3], 4294965248  ;;  %v637_v0 = vld [vmem:[#allocation2 + $0x10] sm:$0xff]  ;;  %v639_v1 = vld [vmem:[#allocation2] sm:$0xff]  ;;  %s622_s13 = smov 127   ;;  %vm57_vm0 = vcmask 1046528  }
   0x7   :  { %118 = vrot.lane.b32.xlu1 %v637_v0, %s622_s13  ;;  %114 = vrot.lane.b32.xlu0 %v639_v1, %s622_s13  ;;  %v29_v2 = vld [vmem:[#allocation2 + $0x20] sm:$0xff]  ;;  %v643_v3 = vld [vmem:[#allocation2 + $0x18] sm:$0xff]  ;;  %v645_v4 = vld [vmem:[#allocation2 + $0x8] sm:$0xff]  ;;  %v61_v28 = vrot.slane %v637_v0, 1  ;;  %v58_v30 = vrot.slane %v639_v1, 1  ;;  %vm467_vm14 = vcmask 121856  }
   0x8   :  { %122 = vrot.lane.b32.xlu2 %v29_v2, %s622_s13  ;;  %v30_v5 = vld [vmem:[#allocation2 + $0x28] sm:$0xff]  ;;  %v649_v6 = vld [vmem:[#allocation2 + $0x38] sm:$0xff]  ;;  %v651_v7 = vld [vmem:[#allocation2 + $0x30] sm:$0xff]  ;;  %v64_v16 = vrot.slane %v29_v2, 1  ;;  %v62_v29 = vrot.slane %v643_v3, 1  ;;  %v59_v31 = vrot.slane %v645_v4, 1 }
   0x9   :  { %v33_v8 = vld [vmem:[#allocation2 + $0x40] sm:$0xff]  ;;  %v655_v9 = vld [vmem:[#allocation2 + $0x50] sm:$0xff]  ;;  %v657_v10 = vld [vmem:[#allocation2 + $0x48] sm:$0xff]  ;;  %v65_v17 = vrot.slane %v30_v5, 1  ;;  %v67_v59 = vrot.slane %v651_v7, 1  ;;  %v68_v63 = vrot.slane %v649_v6, 1 }
   0xa   :  { %v659_v11 = vld [vmem:[#allocation2 + $0x58] sm:$0xff]  ;;  %v664_v12 = vld [vmem:[#allocation2 + $0x68] sm:$0xff]  ;;  %v666_v13 = vld [vmem:[#allocation2 + $0x60] sm:$0xff]  ;;  %v71_v32 = vrot.slane %v657_v10, 1  ;;  %v70_v33 = vrot.slane %v33_v8, 1  ;;  %v63_v37 = vsel %vm57_vm0, %v61_v28, %v62_v29  ;;  %v60_v38 = vsel %vm57_vm0, %v58_v30, %v59_v31  ;;  %s518_s15 = sshll.u32 %s1031_s1, 4  ;;  %s519_s15 = int_to_ptr.hbm [resolvable:$true] %s518_s15 }
   0xb   :  { %v668_v14 = vld [vmem:[#allocation2 + $0x70] sm:$0xff]  ;;  %v673_v15 = vld [vmem:[#allocation2 + $0x78] sm:$0xff]  ;;  %v66_v19 = vsel %vm57_vm0, %v64_v16, %v65_v17  ;;  %v103_v26 = vsub.f32 %v30_v5, %v65_v17  ;;  %v100_v44 = vsub.f32 %v637_v0, %v63_v37  ;;  %v98_v46 = vsub.f32 %v639_v1, %v60_v38  ;;  %s623_s16 = smov [#allocation5]  }
   0xc   :  { %v102_v20 = vsub.f32 %v29_v2, %v66_v19  ;;  %v72_v42 = vsel %vm57_vm0, %v70_v33, %v71_v32  ;;  %v101_v58 = vsub.f32 %v643_v3, %v62_v29  ;;  %v99_v61 = vsub.f32 %v645_v4, %v59_v31  ;;  %s516_s17 = sshll.u32 %s623_s16, 4  ;;  %s517_s17 = int_to_ptr.vmem [resolvable:$true] %s516_s17 }
   0xd   :  { %v183_v35 = vmul.f32 %v103_v26, %v103_v26  ;;  %v106_v48 = vsub.f32 %v33_v8, %v72_v42  ;;  %v180_v51 = vmul.f32 %v100_v44, %v100_v44  ;;  %v178_v54 = vmul.f32 %v98_v46, %v98_v46 }
   0xe   :  { %v182_v22 = vmul.f32 %v102_v20, %v102_v20  ;;  %v181_v17 = vmul.f32 %v101_v58, %v101_v58  ;;  %v179_v19 = vmul.f32 %v99_v61, %v99_v61 }
   0xf   :  { %120 = vrot.lane.b32.xlu1 %v643_v3, %s622_s13  ;;  %116 = vrot.lane.b32.xlu0 %v645_v4, %s622_s13  ;;  %v186_v56 = vmul.f32 %v106_v48, %v106_v48 }
  0x10   :  { %124 = vrot.lane.b32.xlu2 %v30_v5, %s622_s13 }
  0x17   :  { %128 = vrot.lane.b32.xlu1 %v649_v6, %s622_s13  ;;  %126 = vrot.lane.b32.xlu0 %v651_v7, %s622_s13 }
  0x18   :  { %130 = vrot.lane.b32.xlu2 %v33_v8, %s622_s13 }
  0x1f   :  { %134 = vrot.lane.b32.xlu1 %v655_v9, %s622_s13  ;;  %132 = vrot.lane.b32.xlu0 %v657_v10, %s622_s13 }
  0x20   :  { %136 = vrot.lane.b32.xlu2 %v659_v11, %s622_s13 }
  0x27   :  { %140 = vrot.lane.b32.xlu1 %v664_v12, %s622_s13  ;;  %138 = vrot.lane.b32.xlu0 %v666_v13, %s622_s13 }
  0x28   :  { %142 = vrot.lane.b32.xlu2 %v668_v14, %s622_s13 }
  0x2f   :  { %144 = vrot.lane.b32.xlu0 %v673_v15, %s622_s13 }
  0x62   :  { %v123_v18 = vpop.permute.xlu2 %122 }
  0x63   :  { %v166_v21 = vsub.f32 %v29_v2, %v123_v18  ;;  %v80_v2 = vrot.slane %v673_v15, 1 }
  0x65   :  { %v198_v23 = vmul.f32 %v166_v21, %v166_v21  ;;  %v74_v21 = vrot.slane %v659_v11, 1 }
  0x67   :  { %v214_v25 = vadd.f32 %v198_v23, %v182_v22  ;;  %v69_v22 = vsel %vm57_vm0, %v67_v59, %v68_v63  ;;  %v73_v23 = vrot.slane %v655_v9, 1 }
  0x68   :  { %v104_v31 = vsub.f32 %v651_v7, %v69_v22 }
  0x69   :  { %v682_v34 = vadd.f32 1e-08, %v214_v25  ;;  %v75_v42 = vsel %vm57_vm0, %v73_v23, %v74_v21 }
  0x6a   :  { %v125_v24 = vpop.permute.xlu2 %124  ;;  %v184_v48 = vmul.f32 %v104_v31, %v104_v31 }
  0x6b   :  { %v167_v27 = vsub.f32 %v30_v5, %v125_v24  ;;  %535 = vrsqrt.f32 %v682_v34  ;;  %vm297_vm1 = vcmp.eq.f32.partialorder %v682_v34, inf  ;;  %vm299_vm2 = vcmp.eq.f32.partialorder %v682_v34, 0.0 }
  0x6d   :  { %v199_v36 = vmul.f32 %v167_v27, %v167_v27 }
  0x6f   :  { %v215_v43 = vadd.f32 %v199_v36, %v183_v35  ;;  %v109_v35 = vsub.f32 %v659_v11, %v74_v21 }
  0x71   :  { %v694_v50 = vadd.f32 1e-08, %v215_v43  ;;  %v696_v53 = vpop.eup %535  ;;  %v189_v61 = vmul.f32 %v109_v35, %v109_v35 }
  0x72   :  { %v131_v39 = vpop.permute.xlu2 %130 }
  0x73   :  { %v170_v49 = vsub.f32 %v33_v8, %v131_v39  ;;  %537 = vrsqrt.f32 %v694_v50  ;;  %v79_v8 = vrot.slane %v668_v14, 1  ;;  %v312_v35 = vand.u32 2147483648, %v694_v50 }
  0x74   :  { %vm309_vm3 = vcmp.eq.f32.partialorder %v694_v50, inf  ;;  %vm311_vm4 = vcmp.eq.f32.partialorder %v694_v50, 0.0 }
  0x75   :  { %v202_v57 = vmul.f32 %v170_v49, %v170_v49  ;;  %v81_v38 = vsel %vm57_vm0, %v79_v8, %v80_v2  ;;  %v108_v49 = vsub.f32 %v655_v9, %v75_v42 }
  0x77   :  { %v218_v16 = vadd.f32 %v202_v57, %v186_v56 }
  0x79   :  { %v119_v40 = vpop.permute.xlu1 %118  ;;  %v115_v41 = vpop.permute.xlu0 %114 }
  0x7a   :  { %v164_v45 = vsub.f32 %v637_v0, %v119_v40  ;;  %v162_v47 = vsub.f32 %v639_v1, %v115_v41  ;;  %v291_v0 = vmul.f32 %v696_v53, %v682_v34  ;;  %v717_v29 = vpop.eup %537  ;;  %v137_v40 = vpop.permute.xlu2 %136 }
  0x7b   :  { %v303_v43 = vmul.f32 %v717_v29, %v694_v50  ;;  %v173_v57 = vsub.f32 %v659_v11, %v137_v40 }
  0x7c   :  { %v196_v52 = vmul.f32 %v164_v45, %v164_v45  ;;  %v194_v55 = vmul.f32 %v162_v47, %v162_v47  ;;  %v292_v24 = vmul.f32 %v696_v53, %v291_v0 }
  0x7d   :  { %v304_v56 = vmul.f32 %v717_v29, %v303_v43  ;;  %v205_v23 = vmul.f32 %v173_v57, %v173_v57 }
  0x7e   :  { %v212_v1 = vadd.f32 %v196_v52, %v180_v51  ;;  %v210_v5 = vadd.f32 %v194_v55, %v178_v54  ;;  %v293_v39 = vmul.f32 0.5, %v292_v24  ;;  %v107_v51 = vsub.f32 %v657_v10, %v71_v32 }
  0x7f   :  { %v76_v52 = vrot.slane %v666_v13, 1  ;;  %v77_v55 = vrot.slane %v664_v12, 1  ;;  %v305_v22 = vmul.f32 0.5, %v304_v56 }
  0x80   :  { %v713_v25 = vadd.f32 1e-08, %v212_v1  ;;  %v715_v27 = vadd.f32 1e-08, %v210_v5  ;;  %v294_v54 = vsub.f32 1.5, %v293_v39  ;;  %v188_v1 = vmul.f32 %v108_v49, %v108_v49 }
  0x81   :  { %v121_v60 = vpop.permute.xlu1 %120  ;;  %v117_v62 = vpop.permute.xlu0 %116  ;;  %v187_v8 = vmul.f32 %v107_v51, %v107_v51  ;;  %v306_v40 = vsub.f32 1.5, %v305_v22 }
  0x82   :  { %v165_v18 = vsub.f32 %v643_v3, %v121_v60  ;;  %v163_v20 = vsub.f32 %v645_v4, %v117_v62  ;;  %v719_v3 = vadd.f32 1e-08, %v218_v16  ;;  %v105_v4 = vsub.f32 %v649_v6, %v68_v63 }
  0x83   :  { %539 = vrsqrt.f32 %v713_v25  ;;  %v300_v60 = vand.u32 2147483648, %v682_v34  ;;  %v295_v11 = vmul.f32 %v696_v53, %v294_v54  ;;  %vm273_vm6 = vcmp.eq.f32.partialorder %v713_v25, inf }
  0x84   :  { %v197_v26 = vmul.f32 %v165_v18, %v165_v18  ;;  %v195_v28 = vmul.f32 %v163_v20, %v163_v20  ;;  %541 = vrsqrt.f32 %v715_v27  ;;  %v185_v47 = vmul.f32 %v105_v4, %v105_v4 }
  0x85   :  { %543 = vrsqrt.f32 %v719_v3  ;;  %v78_v20 = vsel %vm57_vm0, %v76_v52, %v77_v55  ;;  %vm345_vm5 = vcmp.eq.f32.partialorder %v719_v3, inf  ;;  %vm275_vm7 = vcmp.eq.f32.partialorder %v713_v25, 0.0 }
  0x86   :  { %v213_v30 = vadd.f32 %v197_v26, %v181_v17  ;;  %v211_v33 = vadd.f32 %v195_v28, %v179_v19  ;;  %v111_v26 = vsub.f32 %v664_v12, %v77_v55  ;;  %vm249_vm8 = vcmp.eq.f32.partialorder %v715_v27, inf }
  0x87   :  { %vm251_vm9 = vcmp.eq.f32.partialorder %v715_v27, 0.0  ;;  %vm347_vm13 = vcmp.eq.f32.partialorder %v719_v3, 0.0 }
  0x88   :  { %v733_v44 = vadd.f32 1e-08, %v211_v33  ;;  %v737_v46 = vadd.f32 1e-08, %v213_v30  ;;  %v110_v33 = vsub.f32 %v666_v13, %v78_v20 }
  0x89   :  { %v129_v36 = vpop.permute.xlu1 %128  ;;  %v127_v37 = vpop.permute.xlu0 %126 }
  0x8a   :  { %v169_v41 = vsub.f32 %v649_v6, %v129_v36  ;;  %v168_v45 = vsub.f32 %v651_v7, %v127_v37  ;;  %545 = vrsqrt.f32 %v733_v44  ;;  %v112_v6 = vsub.f32 %v668_v14, %v81_v38  ;;  %v749_v59 = vpop.eup %539 }
  0x8b   :  { %547 = vrsqrt.f32 %v737_v46  ;;  %v753_v32 = vpop.eup %541  ;;  %v267_v28 = vmul.f32 %v749_v59, %v713_v25  ;;  %v296_v37 = vmul.f32 %v295_v11, %v682_v34  ;;  %v190_v52 = vmul.f32 %v110_v33, %v110_v33 }
  0x8c   :  { %v201_v7 = vmul.f32 %v169_v41, %v169_v41  ;;  %v200_v58 = vmul.f32 %v168_v45, %v168_v45  ;;  %v755_v0 = vmul.f32 %v112_v6, %v112_v6  ;;  %v757_v17 = vpop.eup %543  ;;  %v243_v53 = vmul.f32 %v753_v32, %v715_v27 }
  0x8d   :  { %v339_v4 = vmul.f32 %v757_v17, %v719_v3  ;;  %v221_v41 = vadd.f32 %v205_v23, %v189_v61  ;;  %v268_v45 = vmul.f32 %v749_v59, %v267_v28  ;;  %vm285_vm10 = vcmp.eq.f32.partialorder %v737_v46, inf }
  0x8e   :  { %v217_v62 = vadd.f32 %v201_v7, %v185_v47  ;;  %v216_v63 = vadd.f32 %v200_v58, %v184_v48  ;;  %v244_v47 = vmul.f32 %v753_v32, %v243_v53  ;;  %v191_v48 = vmul.f32 %v111_v26, %v111_v26 }
  0x8f   :  { %v307_v58 = vmul.f32 %v717_v29, %v306_v40  ;;  %v802_v61 = vadd.f32 1e-08, %v221_v41  ;;  %v348_v29 = vand.u32 2147483648, %v719_v3  ;;  %v276_v40 = vand.u32 2147483648, %v713_v25 }
  0x90   :  { %v764_v21 = vpop.eup %545  ;;  %v766_v24 = vadd.f32 1e-08, %v216_v63  ;;  %v773_v30 = vadd.f32 1e-08, %v217_v62  ;;  %vm261_vm11 = vcmp.eq.f32.partialorder %v733_v44, inf  ;;  %vm263_vm12 = vcmp.eq.f32.partialorder %v733_v44, 0.0 }
  0x91   :  { %v135_v5 = vpop.permute.xlu1 %134  ;;  %v133_v16 = vpop.permute.xlu0 %132  ;;  %v255_v38 = vmul.f32 %v764_v21, %v733_v44  ;;  %v308_v23 = vmul.f32 %v307_v58, %v694_v50  ;;  %vm287_vm15 = vcmp.eq.f32.partialorder %v737_v46, 0.0 }
  0x92   :  { %v172_v18 = vsub.f32 %v655_v9, %v135_v5  ;;  %v171_v19 = vsub.f32 %v657_v10, %v133_v16  ;;  %v143_v9 = vpop.permute.xlu2 %142  ;;  %v779_v36 = vpop.eup %547  ;;  %549 = vrsqrt.f32 %v766_v24  ;;  %v245_v5 = vmul.f32 0.5, %v244_v47 }
  0x93   :  { %v176_v42 = vsub.f32 %v668_v14, %v143_v9  ;;  %551 = vrsqrt.f32 %v773_v30  ;;  %v279_v6 = vmul.f32 %v779_v36, %v737_v46  ;;  %v340_v14 = vmul.f32 %v757_v17, %v339_v4 }
  0x94   :  { %v204_v10 = vmul.f32 %v172_v18, %v172_v18  ;;  %v203_v31 = vmul.f32 %v171_v19, %v171_v19  ;;  %v256_v7 = vmul.f32 %v764_v21, %v255_v38  ;;  %v246_v9 = vsub.f32 1.5, %v245_v5 }
  0x95   :  { %v208_v62 = vmul.f32 %v176_v42, %v176_v42  ;;  %v280_v11 = vmul.f32 %v779_v36, %v279_v6  ;;  %v113_v4 = vsub.f32 %v673_v15, %v80_v2  ;;  %vm321_vm0 = vcmp.eq.f32.partialorder %v766_v24, inf }
  0x96   :  { %v220_v39 = vadd.f32 %v204_v10, %v188_v1  ;;  %v219_v43 = vadd.f32 %v203_v31, %v187_v8  ;;  %v269_v1 = vmul.f32 0.5, %v268_v45  ;;  %v257_v19 = vmul.f32 0.5, %v256_v7 }
  0x97   :  { %v224_v28 = vadd.f32 %v208_v62, %v755_v0  ;;  %v281_v41 = vmul.f32 0.5, %v280_v11  ;;  %v193_v6 = vmul.f32 %v113_v4, %v113_v4  ;;  %v252_v7 = vand.u32 2147483648, %v715_v27 }
  0x98   :  { %v793_v49 = vadd.f32 1e-08, %v219_v43  ;;  %v797_v55 = vadd.f32 1e-08, %v220_v39  ;;  %v805_v63 = vpop.eup %549  ;;  %v270_v53 = vsub.f32 1.5, %v269_v1  ;;  %v258_v42 = vsub.f32 1.5, %v257_v19 }
  0x99   :  { %v141_v51 = vpop.permute.xlu1 %140  ;;  %v139_v54 = vpop.permute.xlu0 %138  ;;  %v315_v26 = vmul.f32 %v805_v63, %v766_v24  ;;  %v843_v45 = vadd.f32 1e-08, %v224_v28 }
  0x9a   :  { %v175_v56 = vsub.f32 %v664_v12, %v141_v51  ;;  %v174_v57 = vsub.f32 %v666_v13, %v139_v54  ;;  %553 = vrsqrt.f32 %v793_v49  ;;  %v298_v12 = vsel %vm297_vm1, %v682_v34, %v296_v37  ;;  %v813_v18 = vpop.eup %551 }
  0x9b   :  { %v341_v13 = vmul.f32 0.5, %v340_v14  ;;  %555 = vrsqrt.f32 %v797_v55  ;;  %v327_v33 = vmul.f32 %v813_v18, %v773_v30  ;;  %v836_v0 = vsel %vm299_vm2, %v300_v60, %v298_v12 }
  0x9c   :  { %v207_v8 = vmul.f32 %v175_v56, %v175_v56  ;;  %v206_v16 = vmul.f32 %v174_v57, %v174_v57  ;;  %557 = vrsqrt.f32 %v802_v61  ;;  %v316_v43 = vmul.f32 %v805_v63, %v315_v26 }
  0x9d   :  { %v342_v39 = vsub.f32 1.5, %v341_v13  ;;  %v310_v34 = vsel %vm309_vm3, %v694_v50, %v308_v23  ;;  %v271_v47 = vmul.f32 %v749_v59, %v270_v53  ;;  %v282_v59 = vsub.f32 1.5, %v281_v41 }
  0x9e   :  { %v223_v20 = vadd.f32 %v207_v8, %v191_v48  ;;  %v222_v22 = vadd.f32 %v206_v16, %v190_v52  ;;  %v328_v52 = vmul.f32 %v813_v18, %v327_v33  ;;  %v317_v56 = vmul.f32 0.5, %v316_v43 }
  0x9f   :  { %v343_v14 = vmul.f32 %v757_v17, %v342_v39  ;;  %v272_v58 = vmul.f32 %v271_v47, %v713_v25  ;;  %v874_v62 = vsel %vm311_vm4, %v312_v35, %v310_v34  ;;  %v283_v12 = vmul.f32 %v779_v36, %v282_v59 }
  0xa0   :  { %v821_v10 = vadd.f32 1e-08, %v222_v22  ;;  %v826_v31 = vpop.eup %553  ;;  %v830_v37 = vadd.f32 1e-08, %v223_v20  ;;  %v329_v5 = vmul.f32 0.5, %v328_v52  ;;  %v288_v13 = vand.u32 2147483648, %v737_v46 }
  0xa1   :  { %v145_v38 = vpop.permute.xlu0 %144  ;;  %v849_v60 = vpop.eup %555  ;;  %v351_v48 = vmul.f32 %v826_v31, %v793_v49  ;;  %v344_v16 = vmul.f32 %v343_v14, %v719_v3  ;;  %v318_v20 = vsub.f32 1.5, %v317_v56  ;;  %v274_v36 = vsel %vm273_vm6, %v713_v25, %v272_v58 }
  0xa2   :  { %v177_v2 = vsub.f32 %v673_v15, %v145_v38  ;;  %559 = vrsqrt.f32 %v821_v10  ;;  %v247_v15 = vmul.f32 %v753_v32, %v246_v9  ;;  %v855_v51 = vpop.eup %557  ;;  %v259_v32 = vmul.f32 %v764_v21, %v258_v42 }
  0xa3   :  { %561 = vrsqrt.f32 %v830_v37  ;;  %v363_v57 = vmul.f32 %v849_v60, %v797_v55  ;;  %v352_v21 = vmul.f32 %v826_v31, %v351_v48  ;;  %v375_v11 = vmul.f32 %v855_v51, %v802_v61 }
  0xa4   :  { %v209_v54 = vmul.f32 %v177_v2, %v177_v2  ;;  %563 = vrsqrt.f32 %v843_v45  ;;  %v248_v17 = vmul.f32 %v247_v15, %v715_v27  ;;  %v260_v50 = vmul.f32 %v259_v32, %v733_v44 }
  0xa5   :  { %v364_v22 = vmul.f32 %v849_v60, %v363_v57  ;;  %v264_v26 = vand.u32 2147483648, %v733_v44  ;;  %v353_v28 = vmul.f32 0.5, %v352_v21  ;;  %v330_v4 = vsub.f32 1.5, %v329_v5 }
  0xa6   :  { %v225_v8 = vadd.f32 %v209_v54, %v193_v6  ;;  %v250_v23 = vsel %vm249_vm8, %v715_v27, %v248_v17  ;;  %v346_v33 = vsel %vm345_vm5, %v719_v3, %v344_v16  ;;  %v376_v38 = vmul.f32 %v855_v51, %v375_v11 }
  0xa7   :  { %v284_v39 = vmul.f32 %v283_v12, %v737_v46  ;;  %v262_v41 = vsel %vm261_vm11, %v733_v44, %v260_v50  ;;  %v253_v43 = vsel %vm251_vm9, %v252_v7, %v250_v23  ;;  %v319_v34 = vmul.f32 %v805_v63, %v318_v20 }
  0xa8   :  { %v877_v1 = vpop.eup %559  ;;  %v904_v9 = vadd.f32 1e-08, %v225_v8  ;;  %v277_v47 = vsel %vm275_vm7, %v276_v40, %v274_v36  ;;  %v365_v15 = vmul.f32 0.5, %v364_v22  ;;  %v324_v48 = vand.u32 2147483648, %v766_v24 }
  0xa9   :  { %v387_v35 = vmul.f32 %v877_v1, %v821_v10  ;;  %v888_v19 = vpop.eup %561  ;;  %v354_v6 = vsub.f32 1.5, %v353_v28  ;;  %v265_v27 = vsel %vm263_vm12, %v264_v26, %v262_v41  ;;  %v331_v54 = vmul.f32 %v813_v18, %v330_v4 }
  0xaa   :  { %v902_v53 = vpop.eup %563  ;;  %v399_v2 = vmul.f32 %v888_v19, %v830_v37  ;;  %v377_v63 = vmul.f32 0.5, %v376_v38  ;;  %565 = vrsqrt.f32 %v904_v9  ;;  %v286_v25 = vsel %vm285_vm10, %v737_v46, %v284_v39 }
  0xab   :  { %v388_v42 = vmul.f32 %v877_v1, %v387_v35  ;;  %v411_v52 = vmul.f32 %v902_v53, %v843_v45  ;;  %vm323_vm1 = vcmp.eq.f32.partialorder %v766_v24, 0.0  ;;  %vm333_vm2 = vcmp.eq.f32.partialorder %v773_v30, inf }
  0xac   :  { %v400_v14 = vmul.f32 %v888_v19, %v399_v2  ;;  %v320_v59 = vmul.f32 %v319_v34, %v766_v24  ;;  %v336_v44 = vand.u32 2147483648, %v773_v30  ;;  %v366_v32 = vsub.f32 1.5, %v365_v15 }
  0xad   :  { %v389_v40 = vmul.f32 0.5, %v388_v42  ;;  %vm469_vm3 = vcmask 120832   ;;  %vm335_vm4 = vcmp.eq.f32.partialorder %v773_v30, 0.0  ;;  %v355_v18 = vmul.f32 %v826_v31, %v354_v6 }
  0xae   :  { %v412_v7 = vmul.f32 %v902_v53, %v411_v52  ;;  %v468_v56 = vsel %vm467_vm14, %v253_v43, 0.0  ;;  %v470_v57 = vsel %vm469_vm3, %v265_v27, 0.0  ;;  %v289_v58 = vsel %vm287_vm15, %v288_v13, %v286_v25 }
  0xaf   :  { %v332_v17 = vmul.f32 %v331_v54, %v773_v30  ;;  %v378_v21 = vsub.f32 1.5, %v377_v63  ;;  %v471_v5 = vadd.f32 %v470_v57, %v468_v56  ;;  %v349_v8 = vsel %vm347_vm13, %v348_v29, %v346_v33 }
  0xb0   :  { %vm381_vm5 = vcmp.eq.f32.partialorder %v802_v61, inf  ;;  %v390_v31 = vsub.f32 1.5, %v389_v40  ;;  %v401_v16 = vmul.f32 0.5, %v400_v14  ;;  %v472_v11 = vsel %vm467_vm14, %v277_v47, 0.0  ;;  %v566_v12 = vpop.eup %565 }
  0xb1   :  { %v322_v46 = vsel %vm321_vm0, %v766_v24, %v320_v59  ;;  %vm357_vm6 = vcmp.eq.f32.partialorder %v793_v49, inf  ;;  %v367_v13 = vmul.f32 %v849_v60, %v366_v32  ;;  %v473_v50 = vadd.f32 %v472_v11, %v471_v5 }
  0xb2   :  { %v356_v35 = vmul.f32 %v355_v18, %v793_v49  ;;  %v413_v3 = vmul.f32 0.5, %v412_v7  ;;  %v423_v29 = vmul.f32 %v566_v12, %v904_v9  ;;  %v474_v20 = vsel %vm469_vm3, %v289_v58, 0.0 }
  0xb3   :  { %v334_v22 = vsel %vm333_vm2, %v773_v30, %v332_v17  ;;  %vm359_vm7 = vcmp.eq.f32.partialorder %v793_v49, 0.0  ;;  %v379_v36 = vmul.f32 %v855_v51, %v378_v21  ;;  %v475_v23 = vadd.f32 %v474_v20, %v473_v50 }
  0xb4   :  { %vm383_vm8 = vcmp.eq.f32.partialorder %v802_v61, 0.0  ;;  %v391_v60 = vmul.f32 %v877_v1, %v390_v31  ;;  %v402_v26 = vsub.f32 1.5, %v401_v16  ;;  %v424_v28 = vmul.f32 %v566_v12, %v423_v29 }
  0xb5   :  { %v476_v4 = vsel %vm467_vm14, %v836_v0, 0.0  ;;  %v325_v33 = vsel %vm323_vm1, %v324_v48, %v322_v46  ;;  %v360_v38 = vand.u32 2147483648, %v793_v49  ;;  %v368_v39 = vmul.f32 %v367_v13, %v797_v55 }
  0xb6   :  { %v477_v41 = vadd.f32 %v476_v4, %v475_v23  ;;  %v358_v51 = vsel %vm357_vm6, %v793_v49, %v356_v35  ;;  %v414_v42 = vsub.f32 1.5, %v413_v3  ;;  %v425_v2 = vmul.f32 0.5, %v424_v28 }
  0xb7   :  { %v478_v1 = vsel %vm469_vm3, %v874_v62, 0.0  ;;  %v337_v0 = vsel %vm335_vm4, %v336_v44, %v334_v22  ;;  %vm369_vm9 = vcmp.eq.f32.partialorder %v797_v55, inf  ;;  %v380_v24 = vmul.f32 %v379_v36, %v802_v61 }
  0xb8   :  { %v479_v43 = vadd.f32 %v478_v1, %v477_v41  ;;  %v392_v34 = vmul.f32 %v391_v60, %v821_v10  ;;  %v403_v47 = vmul.f32 %v888_v19, %v402_v26  ;;  %v426_v15 = vsub.f32 1.5, %v425_v2 }
  0xb9   :  { %v480_v48 = vsel %vm467_vm14, %v325_v33, 0.0  ;;  %v361_v6 = vsel %vm359_vm7, %v360_v38, %v358_v51  ;;  %vm371_vm10 = vcmp.eq.f32.partialorder %v797_v55, 0.0  ;;  %v372_v30 = vand.u32 2147483648, %v797_v55 }
  0xba   :  { %v481_v62 = vadd.f32 %v480_v48, %v479_v43  ;;  %v370_v52 = vsel %vm369_vm9, %v797_v55, %v368_v39  ;;  %v415_v27 = vmul.f32 %v902_v53, %v414_v42  ;;  %v427_v54 = vmul.f32 %v566_v12, %v426_v15 }
  0xbb   :  { %v482_v63 = vsel %vm469_vm3, %v337_v0, 0.0  ;;  %v382_v19 = vsel %vm381_vm5, %v802_v61, %v380_v24  ;;  %v384_v25 = vand.u32 2147483648, %v802_v61  ;;  %vm393_vm11 = vcmp.eq.f32.partialorder %v821_v10, inf }
  0xbc   :  { %v483_v49 = vadd.f32 %v482_v63, %v481_v62  ;;  %v394_v40 = vsel %vm393_vm11, %v821_v10, %v392_v34  ;;  %v404_v14 = vmul.f32 %v403_v47, %v830_v37  ;;  %v484_v55 = vsel %vm467_vm14, %v349_v8, 0.0 }
  0xbd   :  { %v486_v53 = vsel %vm469_vm3, %v361_v6, 0.0  ;;  %v373_v59 = vsel %vm371_vm10, %v372_v30, %v370_v52  ;;  %v396_v44 = vand.u32 2147483648, %v821_v10  ;;  %vm395_vm12 = vcmp.eq.f32.partialorder %v821_v10, 0.0 }
  0xbe   :  { %v485_v32 = vadd.f32 %v484_v55, %v483_v49  ;;  %vm405_vm13 = vcmp.eq.f32.partialorder %v830_v37, inf  ;;  %v416_v18 = vmul.f32 %v415_v27, %v843_v45  ;;  %v428_v7 = vmul.f32 %v427_v54, %v904_v9 }
  0xbf   :  { %v385_v56 = vsel %vm383_vm8, %v384_v25, %v382_v19  ;;  %v397_v57 = vsel %vm395_vm12, %v396_v44, %v394_v40  ;;  %vm417_vm15 = vcmp.eq.f32.partialorder %v843_v45, inf  ;;  %v406_v17 = vsel %vm405_vm13, %v830_v37, %v404_v14 }
  0xc0   :  { %v487_v58 = vadd.f32 %v486_v53, %v485_v32  ;;  %vm407_vm0 = vcmp.eq.f32.partialorder %v830_v37, 0.0  ;;  %v408_v21 = vand.u32 2147483648, %v830_v37  ;;  %v488_v10 = vsel %vm467_vm14, %v373_v59, 0.0 }
  0xc1   :  { %vm419_vm1 = vcmp.eq.f32.partialorder %v843_v45, 0.0  ;;  %v420_v5 = vand.u32 2147483648, %v843_v45  ;;  %vm429_vm2 = vcmp.eq.f32.partialorder %v904_v9, inf  ;;  %v418_v8 = vsel %vm417_vm15, %v843_v45, %v416_v18 }
  0xc2   :  { %v489_v61 = vadd.f32 %v488_v10, %v487_v58  ;;  %v430_v31 = vsel %vm429_vm2, %v904_v9, %v428_v7  ;;  %v490_v16 = vsel %vm469_vm3, %v385_v56, 0.0  ;;  %v492_v11 = vsel %vm467_vm14, %v397_v57, 0.0 }
  0xc3   :  { %v409_v12 = vsel %vm407_vm0, %v408_v21, %v406_v17  ;;  %v432_v37 = vand.u32 2147483648, %v904_v9  ;;  %vm431_vm4 = vcmp.eq.f32.partialorder %v904_v9, 0.0  ;;  %v421_v13 = vsel %vm419_vm1, %v420_v5, %v418_v8 }
  0xc4   :  { %v491_v46 = vadd.f32 %v490_v16, %v489_v61  ;;  %v494_v3 = vsel %vm469_vm3, %v409_v12, 0.0  ;;  %v496_v45 = vsel %vm467_vm14, %v421_v13, 0.0 }
  0xc5   :  { %v433_v50 = vsel %vm431_vm4, %v432_v37, %v430_v31 }
  0xc6   :  { %v493_v35 = vadd.f32 %v492_v11, %v491_v46  ;;  %v498_v20 = vsel %vm469_vm3, %v433_v50, 0.0 }
  0xc8   :  { %v495_v29 = vadd.f32 %v494_v3, %v493_v35 }
  0xca   :  { %v497_v22 = vadd.f32 %v496_v45, %v495_v29 }
  0xcc   :  { %v499_v36 = vadd.f32 %v498_v20, %v497_v22 }
  0xce   :  { %500 = vadd.xlane.f32.xlu1 %v499_v36 }
 0x141   :  { %v501_v23 = vpop.xlane.xlu1 %500 }
 0x142   :  { %v502_v60 = vrot.slane %v501_v23, 4 }
 0x144   :  { %v503_v26 = vadd.f32 %v502_v60, %v501_v23 }
 0x146   :  { %v504_v28 = vrot.slane %v503_v26, 2 }
 0x148   :  { %v505_v4 = vadd.f32 %v504_v28, %v503_v26 }
 0x14a   :  { %v506_v33 = vrot.slane %v505_v4, 1 }
 0x14c   :  { %v507_v9 = vadd.f32 %v506_v33, %v505_v4 }
 0x14e   :  { %528 = vpush %v507_v9 }
 0x17f   :  { %s529_s18 = spop %528 }
 0x180   :  { %v509_v38 = vstv %s529_s18 }
 0x181   :  { %510 = vst [vmem:[#allocation5] sm:$0xff] %v509_v38 }
 0x182   :  { %521 = dma.vmem_to_hbm [thread:$0]  %s517_s17, 128, %s519_s15, [#allocation4]  }
 0x183   :  { %617 = dma.done.wait [#allocation4], 128  }
 0x184   :  { %618 = vsyncadd [#allocation4], 4294967168 }
 0x185   :  { %526 = vsyncpa [#allocation3], 1 }
 0x186   :  { %527 = vsyncpa [#allocation4], 1 }

</bundles_post_ra>
